<compile_context>
chip_gen: v7x
topology: tpu7x:2x2x1
jax: 0.10.0
libtpu: 0.0.40
codegen_flags: <defaults>
</compile_context>

<pallas_src>
import jax
import jax.numpy as jnp
from jax.experimental import pallas as pl
from jax.experimental.pallas import tpu as pltpu

INPUT = 2
HIDDEN = 5
OUTPUT = 1  # kernel's dense output slab assumes OUTPUT == 1 (as in the spec)


def _mlp_kernel(w12_ref, b2_ref, w3_ref, b3_ref, x_ref, o_ref):
    # w12_ref : SMEM (HIDDEN, INPUT)  folded fc1+fc2 weight, w12[h, k]
    # b2_ref  : SMEM (HIDDEN,)        fc2 bias
    # w3_ref  : SMEM (HIDDEN,)        fc3 weight column (OUTPUT == 1)
    # b3_ref  : SMEM (1,)             fc3 bias
    # x_ref   : VMEM (INPUT, rows, 128)  batch packed on (sublane, lane)
    # o_ref   : VMEM (rows, 128)         dense output slab
    x0 = x_ref[0]                      # (rows, 128) -- full dense vregs
    x1 = x_ref[1]                      # (rows, 128)

    acc = None
    for h in range(HIDDEN):            # HIDDEN = 5, fully unrolled
        # fc1 folded into fc2: z2[h] = w12[h,0]*x0 + w12[h,1]*x1 + b2[h]
        # scalar-from-SMEM * full vreg -> plain VPU splat FMA, no broadcasts.
        z2 = w12_ref[h, 0] * x0 + w12_ref[h, 1] * x1 + b2_ref[h]
        h2 = jax.nn.sigmoid(z2)        # EUP on full (rows, 128) blocks
        t = w3_ref[h] * h2             # fc3 partial product
        acc = t if acc is None else acc + t
    o_ref[...] = jax.nn.sigmoid(acc + b3_ref[0])   # full-width unmasked store


def net_forward(x, w1, w2, b2, w3, b3, *, block_rows=64):
    """x: (B, INPUT) f32.  Weights in (in, out) layout, biases as (1, out).

    Returns (B, OUTPUT) f32, same math as the PyTorch Net.forward.
    """
    B = x.shape[0]

    # Fold fc1 into fc2 (exact up to f32 reassociation: no bias/act between).
    w12 = (w1 @ w2).T.astype(jnp.float32)                        # (HIDDEN, INPUT)
    b2v = b2.reshape(HIDDEN).astype(jnp.float32)                 # (HIDDEN,)
    w3v = w3.reshape(HIDDEN, OUTPUT)[:, 0].astype(jnp.float32)   # (HIDDEN,)
    b3v = b3.reshape(OUTPUT).astype(jnp.float32)                 # (1,)

    # Batch slab geometry: batch index b -> (row, lane) = (b // 128, b % 128).
    rows_needed = pl.cdiv(B, 128)
    block_rows = max(8, (block_rows // 8) * 8)                   # sublane aligned
    rows_blk = min(block_rows, ((rows_needed + 7) // 8) * 8)
    n_tiles = pl.cdiv(rows_needed, rows_blk)
    R = n_tiles * rows_blk
    Bp = R * 128

    # Single fused pad + relayout pass (no zeros+scatter, no output transpose).
    xp = jnp.pad(x.astype(jnp.float32), ((0, Bp - B), (0, 0)))   # (Bp, INPUT)
    x_slab = xp.reshape(R, 128, INPUT).transpose(2, 0, 1)        # (INPUT, R, 128)

    smem = pl.BlockSpec(memory_space=pltpu.MemorySpace.SMEM)
    out_slab = pl.pallas_call(
        _mlp_kernel,
        out_shape=jax.ShapeDtypeStruct((R, 128), jnp.float32),
        grid_spec=pltpu.PrefetchScalarGridSpec(
            num_scalar_prefetch=0,
            grid=(n_tiles,),
            in_specs=[
                smem,                                               # w12 scalars
                smem,                                               # b2 scalars
                smem,                                               # w3 scalars
                smem,                                               # b3 scalar
                pl.BlockSpec((INPUT, rows_blk, 128), lambda i: (0, i, 0)),
            ],
            out_specs=pl.BlockSpec((rows_blk, 128), lambda i: (i, 0)),
        ),
        compiler_params=pltpu.CompilerParams(
            dimension_semantics=("parallel",),   # batch rows -> both TCs on v7x
        ),
    )(w12, b2v, w3v, b3v, x_slab)

    # (R,128) -> (Bp,) is a free contiguous reshape; slice off padding, no .T.
    return out_slab.reshape(Bp)[:B].reshape(B, OUTPUT)


if __name__ == "__main__":
    key = jax.random.PRNGKey(0)
    kx, k1, k2, kb2, k3, kb3 = jax.random.split(key, 6)

    B = 500  # not a multiple of 128 -> exercises the ragged-padding path
    x = jax.random.normal(kx, (B, INPUT), dtype=jnp.float32)

    # Deterministic params (PyTorch shapes fc1 (5,2), fc2 (5,5)+(5,),
    # fc3 (1,5)+(1,)), stored transposed as (in, out) for the wrapper.
    w1 = jax.random.normal(k1, (INPUT, HIDDEN), dtype=jnp.float32) * 0.5
    w2 = jax.random.normal(k2, (HIDDEN, HIDDEN), dtype=jnp.float32) * 0.5
    b2 = jax.random.normal(kb2, (1, HIDDEN), dtype=jnp.float32) * 0.1
    w3 = jax.random.normal(k3, (HIDDEN, OUTPUT), dtype=jnp.float32) * 0.5
    b3 = jax.random.normal(kb3, (1, OUTPUT), dtype=jnp.float32) * 0.1

    # Reference: plain JAX, same math as the PyTorch forward.
    ref = jax.nn.sigmoid(jax.nn.sigmoid((x @ w1) @ w2 + b2) @ w3 + b3)

    # Single-tile path (whole padded batch in one 8x128-row slab).
    out = net_forward(x, w1, w2, b2, w3, b3)
    jax.block_until_ready(out)
    assert out.shape == (B, OUTPUT)
    assert jnp.allclose(out, ref, atol=2e-5), "mismatch vs reference (1 tile)"

    # Multi-tile path (grid > 1, ragged last tile, megacore-parallel axis).
    B2 = 2500
    x2 = jax.random.normal(kx, (B2, INPUT), dtype=jnp.float32)
    ref2 = jax.nn.sigmoid(jax.nn.sigmoid((x2 @ w1) @ w2 + b2) @ w3 + b3)
    out2 = net_forward(x2, w1, w2, b2, w3, b3, block_rows=8)
    jax.block_until_ready(out2)
    assert out2.shape == (B2, OUTPUT)
    assert jnp.allclose(out2, ref2, atol=2e-5), "mismatch vs reference (multi-tile)"

    print("KERNEL_OK")
</pallas_src>

<mosaic_0001>
module attributes {stable_mosaic.version = 11 : i64} {
  func.func @_mlp_kernel(%arg0: i32, %arg1: memref<5x2xf32, #tpu.memory_space<smem>>, %arg2: memref<5xf32, #tpu.memory_space<smem>>, %arg3: memref<5xf32, #tpu.memory_space<smem>>, %arg4: memref<1xf32, #tpu.memory_space<smem>>, %arg5: memref<2x8x128xf32, #tpu.memory_space<vmem>>, %arg6: memref<8x128xf32, #tpu.memory_space<vmem>>) attributes {dimension_semantics = [#tpu.dimension_semantics<parallel>], iteration_bounds = array<i64: 1>, scalar_prefetch = 0 : i64, scratch_operands = 0 : i64, tpu.core_type = #tpu.core_type<tc>, window_params = [{transform_indices = @transform_0, window_bounds = array<i64: 5, 2>}, {transform_indices = @transform_1, window_bounds = array<i64: 5>}, {transform_indices = @transform_2, window_bounds = array<i64: 5>}, {transform_indices = @transform_3, window_bounds = array<i64: 1>}, {transform_indices = @transform_4, window_bounds = array<i64: 2, 8, 128>}, {transform_indices = @transform_5, window_bounds = array<i64: 8, 128>}]} {
    %c0 = arith.constant 0 : index
    %c0_0 = arith.constant 0 : index
    %c0_1 = arith.constant 0 : index
    %0 = vector.load %arg5[%c0, %c0_0, %c0_1] : memref<2x8x128xf32, #tpu.memory_space<vmem>>, vector<1x8x128xf32>
    %1 = vector.shape_cast %0 : vector<1x8x128xf32> to vector<8x128xf32>
    %c1 = arith.constant 1 : index
    %c0_2 = arith.constant 0 : index
    %c0_3 = arith.constant 0 : index
    %2 = vector.load %arg5[%c1, %c0_2, %c0_3] : memref<2x8x128xf32, #tpu.memory_space<vmem>>, vector<1x8x128xf32>
    %3 = vector.shape_cast %2 : vector<1x8x128xf32> to vector<8x128xf32>
    %c0_4 = arith.constant 0 : index
    %c0_5 = arith.constant 0 : index
    %4 = memref.load %arg1[%c0_4, %c0_5] : memref<5x2xf32, #tpu.memory_space<smem>>
    %5 = vector.broadcast %4 : f32 to vector<8x128xf32>
    %6 = arith.mulf %5, %1 : vector<8x128xf32>
    %c0_6 = arith.constant 0 : index
    %c1_7 = arith.constant 1 : index
    %7 = memref.load %arg1[%c0_6, %c1_7] : memref<5x2xf32, #tpu.memory_space<smem>>
    %8 = vector.broadcast %7 : f32 to vector<8x128xf32>
    %9 = arith.mulf %8, %3 : vector<8x128xf32>
    %10 = arith.addf %6, %9 : vector<8x128xf32>
    %c0_8 = arith.constant 0 : index
    %11 = memref.load %arg2[%c0_8] : memref<5xf32, #tpu.memory_space<smem>>
    %12 = vector.broadcast %11 : f32 to vector<8x128xf32>
    %13 = arith.addf %10, %12 : vector<8x128xf32>
    %14 = arith.negf %13 : vector<8x128xf32>
    %15 = math.exp %14 : vector<8x128xf32>
    %cst = arith.constant 1.000000e+00 : f32
    %16 = vector.broadcast %cst : f32 to vector<8x128xf32>
    %17 = arith.addf %16, %15 : vector<8x128xf32>
    %18 = arith.divf %16, %17 : vector<8x128xf32>
    %c0_9 = arith.constant 0 : index
    %19 = memref.load %arg3[%c0_9] : memref<5xf32, #tpu.memory_space<smem>>
    %20 = vector.broadcast %19 : f32 to vector<8x128xf32>
    %21 = arith.mulf %20, %18 : vector<8x128xf32>
    %c1_10 = arith.constant 1 : index
    %c0_11 = arith.constant 0 : index
    %22 = memref.load %arg1[%c1_10, %c0_11] : memref<5x2xf32, #tpu.memory_space<smem>>
    %23 = vector.broadcast %22 : f32 to vector<8x128xf32>
    %24 = arith.mulf %23, %1 : vector<8x128xf32>
    %c1_12 = arith.constant 1 : index
    %c1_13 = arith.constant 1 : index
    %25 = memref.load %arg1[%c1_12, %c1_13] : memref<5x2xf32, #tpu.memory_space<smem>>
    %26 = vector.broadcast %25 : f32 to vector<8x128xf32>
    %27 = arith.mulf %26, %3 : vector<8x128xf32>
    %28 = arith.addf %24, %27 : vector<8x128xf32>
    %c1_14 = arith.constant 1 : index
    %29 = memref.load %arg2[%c1_14] : memref<5xf32, #tpu.memory_space<smem>>
    %30 = vector.broadcast %29 : f32 to vector<8x128xf32>
    %31 = arith.addf %28, %30 : vector<8x128xf32>
    %32 = arith.negf %31 : vector<8x128xf32>
    %33 = math.exp %32 : vector<8x128xf32>
    %cst_15 = arith.constant 1.000000e+00 : f32
    %34 = vector.broadcast %cst_15 : f32 to vector<8x128xf32>
    %35 = arith.addf %34, %33 : vector<8x128xf32>
    %36 = arith.divf %34, %35 : vector<8x128xf32>
    %c1_16 = arith.constant 1 : index
    %37 = memref.load %arg3[%c1_16] : memref<5xf32, #tpu.memory_space<smem>>
    %38 = vector.broadcast %37 : f32 to vector<8x128xf32>
    %39 = arith.mulf %38, %36 : vector<8x128xf32>
    %40 = arith.addf %21, %39 : vector<8x128xf32>
    %c2 = arith.constant 2 : index
    %c0_17 = arith.constant 0 : index
    %41 = memref.load %arg1[%c2, %c0_17] : memref<5x2xf32, #tpu.memory_space<smem>>
    %42 = vector.broadcast %41 : f32 to vector<8x128xf32>
    %43 = arith.mulf %42, %1 : vector<8x128xf32>
    %c2_18 = arith.constant 2 : index
    %c1_19 = arith.constant 1 : index
    %44 = memref.load %arg1[%c2_18, %c1_19] : memref<5x2xf32, #tpu.memory_space<smem>>
    %45 = vector.broadcast %44 : f32 to vector<8x128xf32>
    %46 = arith.mulf %45, %3 : vector<8x128xf32>
    %47 = arith.addf %43, %46 : vector<8x128xf32>
    %c2_20 = arith.constant 2 : index
    %48 = memref.load %arg2[%c2_20] : memref<5xf32, #tpu.memory_space<smem>>
    %49 = vector.broadcast %48 : f32 to vector<8x128xf32>
    %50 = arith.addf %47, %49 : vector<8x128xf32>
    %51 = arith.negf %50 : vector<8x128xf32>
    %52 = math.exp %51 : vector<8x128xf32>
    %cst_21 = arith.constant 1.000000e+00 : f32
    %53 = vector.broadcast %cst_21 : f32 to vector<8x128xf32>
    %54 = arith.addf %53, %52 : vector<8x128xf32>
    %55 = arith.divf %53, %54 : vector<8x128xf32>
    %c2_22 = arith.constant 2 : index
    %56 = memref.load %arg3[%c2_22] : memref<5xf32, #tpu.memory_space<smem>>
    %57 = vector.broadcast %56 : f32 to vector<8x128xf32>
    %58 = arith.mulf %57, %55 : vector<8x128xf32>
    %59 = arith.addf %40, %58 : vector<8x128xf32>
    %c3 = arith.constant 3 : index
    %c0_23 = arith.constant 0 : index
    %60 = memref.load %arg1[%c3, %c0_23] : memref<5x2xf32, #tpu.memory_space<smem>>
    %61 = vector.broadcast %60 : f32 to vector<8x128xf32>
    %62 = arith.mulf %61, %1 : vector<8x128xf32>
    %c3_24 = arith.constant 3 : index
    %c1_25 = arith.constant 1 : index
    %63 = memref.load %arg1[%c3_24, %c1_25] : memref<5x2xf32, #tpu.memory_space<smem>>
    %64 = vector.broadcast %63 : f32 to vector<8x128xf32>
    %65 = arith.mulf %64, %3 : vector<8x128xf32>
    %66 = arith.addf %62, %65 : vector<8x128xf32>
    %c3_26 = arith.constant 3 : index
    %67 = memref.load %arg2[%c3_26] : memref<5xf32, #tpu.memory_space<smem>>
    %68 = vector.broadcast %67 : f32 to vector<8x128xf32>
    %69 = arith.addf %66, %68 : vector<8x128xf32>
    %70 = arith.negf %69 : vector<8x128xf32>
    %71 = math.exp %70 : vector<8x128xf32>
    %cst_27 = arith.constant 1.000000e+00 : f32
    %72 = vector.broadcast %cst_27 : f32 to vector<8x128xf32>
    %73 = arith.addf %72, %71 : vector<8x128xf32>
    %74 = arith.divf %72, %73 : vector<8x128xf32>
    %c3_28 = arith.constant 3 : index
    %75 = memref.load %arg3[%c3_28] : memref<5xf32, #tpu.memory_space<smem>>
    %76 = vector.broadcast %75 : f32 to vector<8x128xf32>
    %77 = arith.mulf %76, %74 : vector<8x128xf32>
    %78 = arith.addf %59, %77 : vector<8x128xf32>
    %c4 = arith.constant 4 : index
    %c0_29 = arith.constant 0 : index
    %79 = memref.load %arg1[%c4, %c0_29] : memref<5x2xf32, #tpu.memory_space<smem>>
    %80 = vector.broadcast %79 : f32 to vector<8x128xf32>
    %81 = arith.mulf %80, %1 : vector<8x128xf32>
    %c4_30 = arith.constant 4 : index
    %c1_31 = arith.constant 1 : index
    %82 = memref.load %arg1[%c4_30, %c1_31] : memref<5x2xf32, #tpu.memory_space<smem>>
    %83 = vector.broadcast %82 : f32 to vector<8x128xf32>
    %84 = arith.mulf %83, %3 : vector<8x128xf32>
    %85 = arith.addf %81, %84 : vector<8x128xf32>
    %c4_32 = arith.constant 4 : index
    %86 = memref.load %arg2[%c4_32] : memref<5xf32, #tpu.memory_space<smem>>
    %87 = vector.broadcast %86 : f32 to vector<8x128xf32>
    %88 = arith.addf %85, %87 : vector<8x128xf32>
    %89 = arith.negf %88 : vector<8x128xf32>
    %90 = math.exp %89 : vector<8x128xf32>
    %cst_33 = arith.constant 1.000000e+00 : f32
    %91 = vector.broadcast %cst_33 : f32 to vector<8x128xf32>
    %92 = arith.addf %91, %90 : vector<8x128xf32>
    %93 = arith.divf %91, %92 : vector<8x128xf32>
    %c4_34 = arith.constant 4 : index
    %94 = memref.load %arg3[%c4_34] : memref<5xf32, #tpu.memory_space<smem>>
    %95 = vector.broadcast %94 : f32 to vector<8x128xf32>
    %96 = arith.mulf %95, %93 : vector<8x128xf32>
    %97 = arith.addf %78, %96 : vector<8x128xf32>
    %c0_35 = arith.constant 0 : index
    %98 = memref.load %arg4[%c0_35] : memref<1xf32, #tpu.memory_space<smem>>
    %99 = vector.broadcast %98 : f32 to vector<8x128xf32>
    %100 = arith.addf %97, %99 : vector<8x128xf32>
    %101 = arith.negf %100 : vector<8x128xf32>
    %102 = math.exp %101 : vector<8x128xf32>
    %cst_36 = arith.constant 1.000000e+00 : f32
    %103 = vector.broadcast %cst_36 : f32 to vector<8x128xf32>
    %104 = arith.addf %103, %102 : vector<8x128xf32>
    %105 = arith.divf %103, %104 : vector<8x128xf32>
    %c0_37 = arith.constant 0 : index
    %c0_38 = arith.constant 0 : index
    %106 = vector.load %arg6[%c0_37, %c0_38] : memref<8x128xf32, #tpu.memory_space<vmem>>, vector<8x128xf32>
    tpu.vector_store %arg6[%c0_37, %c0_38], %105 {strides = array<i32>} : memref<8x128xf32, #tpu.memory_space<vmem>>, vector<8x128xf32>,
    return
  }
  func.func @transform_0(%arg0: i32) -> (i32, i32) {
    %c0_i32 = arith.constant 0 : i32
    %c0_i32_0 = arith.constant 0 : i32
    %c0_i32_1 = arith.constant 0 : i32
    return %c0_i32, %c0_i32_0 : i32, i32
  }
  func.func @transform_1(%arg0: i32) -> i32 {
    %c0_i32 = arith.constant 0 : i32
    %c0_i32_0 = arith.constant 0 : i32
    return %c0_i32 : i32
  }
  func.func @transform_2(%arg0: i32) -> i32 {
    %c0_i32 = arith.constant 0 : i32
    %c0_i32_0 = arith.constant 0 : i32
    return %c0_i32 : i32
  }
  func.func @transform_3(%arg0: i32) -> i32 {
    %c0_i32 = arith.constant 0 : i32
    %c0_i32_0 = arith.constant 0 : i32
    return %c0_i32 : i32
  }
  func.func @transform_4(%arg0: i32) -> (i32, i32, i32) {
    %c0_i32 = arith.constant 0 : i32
    %c0_i32_0 = arith.constant 0 : i32
    %c0_i32_1 = arith.constant 0 : i32
    return %c0_i32, %arg0, %c0_i32_0 : i32, i32, i32
  }
  func.func @transform_5(%arg0: i32) -> (i32, i32) {
    %c0_i32 = arith.constant 0 : i32
    %c0_i32_0 = arith.constant 0 : i32
    return %arg0, %c0_i32 : i32, i32
  }
}

</mosaic_0001>

<bundles_post_ra>
// kernel: tpu_custom_call.1
= control target key start
LH: loop header
LB: loop body
LE: loop exit
PB: predicated region body
PF: predicated region fallthrough
CT: control target
= control target key end

     0   :  { %11 = vsyncpa [#allocation5], 0  ;;  %s375_s0 = inlined_call_operand.vmem [shape: f32[5,2], index: 0, kind: input, shape index: {}]   ;;  %s376_s1 = inlined_call_operand.vmem [shape: f32[5], index: 1, kind: input, shape index: {}]   ;;  %s377_s2 = inlined_call_operand.vmem [shape: f32[5], index: 2, kind: input, shape index: {}]   ;;  %s378_s3 = inlined_call_operand.<no memory space> [shape: f32[1], index: 3, kind: input, shape index: {}]   ;;  %s379_s4 = inlined_call_operand.vmem [shape: f32[2,8,128], index: 4, kind: input, shape index: {}]   ;;  %s380_s5 = inlined_call_operand.hbm [shape: f32[8,128], index: 5, kind: output, shape index: {}]  }
   0x1   :  { %12 = vsyncpa [#allocation7], 0  ;;  %s30_s20 = sshll.u32 %s376_s1, 4  ;;  %s31_s20 = int_to_ptr.vmem [resolvable:$true] %s30_s20 }
   0x2   :  { %13 = vsyncpa [#allocation4], 0  ;;  %s20_s23 = sshll.u32 %s375_s0, 4  ;;  %s238_s24 = scalar_lea.vmem %s31_s20, 16  ;;  %s21_s23 = int_to_ptr.vmem [resolvable:$true] %s20_s23 }
   0x3   :  { %p239_p0 = scmp.ne.s32.totalorder %s31_s20, %s238_s24  ;;  %p243_p1 = scmp.lt.s32.totalorder %s31_s20, %s31_s20 }
   0x4   :  { %p244_p2 = scmp.lt.s32.totalorder %s238_s24, %s238_s24 }
   0x6   :  { %p245_p3 = por %p244_p2, %p243_p1 }
   0x8   :  { %p246_p4 = pnand %p245_p3, %p239_p0 }
   0xa   :  { %249 = shalt.err (!%p246_p4)
}
   0xb   :  { %s302_s25 = smov [#allocation6]   ;;  %s250_s26 = scalar_lea.vmem %s21_s23, 128 }
   0xc   :  { %33 = dma.vmem_to_smem %s31_s20, 16, %s302_s25, [#allocation7]  }
   0xd   :  { %p251_p5 = scmp.ne.s32.totalorder %s21_s23, %s250_s26  ;;  %p255_p6 = scmp.lt.s32.totalorder %s21_s23, %s21_s23 }
   0xe   :  { %p256_p7 = scmp.lt.s32.totalorder %s250_s26, %s250_s26 }
  0x10   :  { %p257_p8 = por %p256_p7, %p255_p6 }
  0x12   :  { %p258_p9 = pnand %p257_p8, %p251_p5 }
  0x14   :  { %261 = shalt.err (!%p258_p9)
}
  0x15   :  { %s303_s1 = smov [#allocation3]   ;;  %s40_s28 = sshll.u32 %s377_s2, 4  ;;  %s41_s28 = int_to_ptr.vmem [resolvable:$true] %s40_s28 }
  0x16   :  { %23 = dma.vmem_to_smem %s21_s23, 128, %s303_s1, [#allocation5]  }
  0x17   :  { %s262_s29 = scalar_lea.vmem %s41_s28, 16  ;;  %p267_p11 = scmp.lt.s32.totalorder %s41_s28, %s41_s28 }
  0x18   :  { %p263_p10 = scmp.ne.s32.totalorder %s41_s28, %s262_s29  ;;  %p268_p12 = scmp.lt.s32.totalorder %s262_s29, %s262_s29 }
  0x1a   :  { %p269_p13 = por %p268_p12, %p267_p11 }
  0x1c   :  { %p270_p0 = pnand %p269_p13, %p263_p10 }
  0x1e   :  { %273 = shalt.err (!%p270_p0)
}
  0x1f   :  { %s304_s30 = smov [#allocation8]  }
  0x20   :  { %43 = dma.vmem_to_smem %s41_s28, 16, %s304_s30, [#allocation7]  }
  0x21   :  { %296 = dma.done.wait [#allocation5], 128  }
  0x22   :  { %297 = vsyncadd [#allocation5], 4294967168 }
  0x23   :  { %298 = dma.done.wait [#allocation7], 32  }
  0x24   :  { %299 = vsyncadd [#allocation7], 4294967264 }
  0x25   :  { %57 = sfence }
  0x26   :  { %s61_s6 = sld [smem:[#allocation3]]  ;;  %s187_s7 = sld [smem:[#allocation3 + $0x1]]  ;;  %v58_v0 = vld [vmem:[%s379_s4] sm:$0xff]  ;;  %v186_v1 = vld [vmem:[%s379_s4 + $0x8] sm:$0xff] }
  0x27   :  { %s68_s8 = sld [smem:[#allocation6]]  ;;  %s190_s2 = sld [smem:[#allocation3 + $0x81]] }
  0x28   :  { %s189_s9 = sld [smem:[#allocation3 + $0x80]]  ;;  %s345_s10 = sld [smem:[#allocation6 + $0x1]] }
  0x29   :  { %s194_s15 = sld [smem:[#allocation3 + $0x100]]  ;;  %s195_s16 = sld [smem:[#allocation3 + $0x101]] }
  0x2a   :  { %s353_s17 = sld [smem:[#allocation6 + $0x2]]  ;;  %s199_s18 = sld [smem:[#allocation3 + $0x180]] }
  0x2b   :  { %s200_s19 = sld [smem:[#allocation3 + $0x181]]  ;;  %s355_s20 = sld [smem:[#allocation6 + $0x3]] }
  0x2c   :  { %v62_v2 = vstv %s61_s6  ;;  %v65_v3 = vstv %s187_s7  ;;  %s204_s21 = sld [smem:[#allocation3 + $0x200]]  ;;  %s205_s22 = sld [smem:[#allocation3 + $0x201]] }
  0x2d   :  { %v63_v4 = vmul.f32 %v62_v2, %v58_v0  ;;  %v66_v5 = vmul.f32 %v186_v1, %v65_v3  ;;  %v69_v6 = vstv %s68_s8  ;;  %v84_v8 = vstv %s190_s2  ;;  %s206_s4 = sld [smem:[#allocation6 + $0x4]]  ;;  %s77_s23 = sld [smem:[#allocation8]] }
  0x2e   :  { %v81_v7 = vstv %s189_s9  ;;  %v85_v11 = vmul.f32 %v186_v1, %v84_v8  ;;  %v88_v12 = vstv %s345_s10  ;;  %s193_s24 = sld [smem:[#allocation8 + $0x1]]  ;;  %s198_s25 = sld [smem:[#allocation8 + $0x2]] }
  0x2f   :  { %v67_v9 = vadd.f32 %v66_v5, %v63_v4  ;;  %v82_v10 = vmul.f32 %v81_v7, %v58_v0  ;;  %v101_v13 = vstv %s194_s15  ;;  %v104_v14 = vstv %s195_s16  ;;  %s203_s26 = sld [smem:[#allocation8 + $0x3]]  ;;  %s208_s1 = sld [smem:[#allocation8 + $0x4]] }
  0x30   :  { %v102_v17 = vmul.f32 %v101_v13, %v58_v0  ;;  %v105_v18 = vmul.f32 %v186_v1, %v104_v14  ;;  %v108_v19 = vstv %s353_s17  ;;  %v121_v20 = vstv %s199_s18  ;;  %s305_s28 = smov [#allocation9]  }
  0x31   :  { %v70_v15 = vadd.f32 %v69_v6, %v67_v9  ;;  %v86_v16 = vadd.f32 %v85_v11, %v82_v10  ;;  %v124_v21 = vstv %s200_s19  ;;  %v122_v25 = vmul.f32 %v121_v20, %v58_v0  ;;  %s176_s29 = sshll.u32 %s305_s28, 4  ;;  %s177_s29 = int_to_ptr.vmem [resolvable:$true] %s176_s29 }
  0x32   :  { %v106_v24 = vadd.f32 %v105_v18, %v102_v17  ;;  %v125_v26 = vmul.f32 %v186_v1, %v124_v21  ;;  %v128_v27 = vstv %s355_s20  ;;  %v141_v28 = vstv %s204_s21  ;;  %s274_s30 = scalar_lea.vmem %s177_s29, 128  ;;  %p279_p2 = scmp.lt.s32.totalorder %s177_s29, %s177_s29 }
  0x33   :  { %v188_v22 = vmul.f32 -1.442695, %v70_v15  ;;  %v89_v23 = vadd.f32 %v88_v12, %v86_v16  ;;  %v142_v31 = vmul.f32 %v141_v28, %v58_v0  ;;  %v144_v33 = vstv %s205_s22  ;;  %p275_p1 = scmp.ne.s32.totalorder %s177_s29, %s274_s30  ;;  %p280_p3 = scmp.lt.s32.totalorder %s274_s30, %s274_s30 }
  0x34   :  { %v109_v30 = vadd.f32 %v108_v19, %v106_v24  ;;  %v126_v32 = vadd.f32 %v125_v26, %v122_v25  ;;  %v145_v35 = vmul.f32 %v186_v1, %v144_v33  ;;  %v148_v37 = vstv %s206_s4 }
  0x35   :  { %214 = vpow2.f32 %v188_v22  ;;  %v192_v29 = vmul.f32 -1.442695, %v89_v23  ;;  %v78_v51 = vstv %s77_s23  ;;  %v97_v54 = vstv %s193_s24  ;;  %p281_p4 = por %p280_p3, %p279_p2 }
  0x36   :  { %v197_v34 = vmul.f32 -1.442695, %v109_v30  ;;  %v129_v36 = vadd.f32 %v128_v27, %v126_v32  ;;  %v146_v38 = vadd.f32 %v145_v35, %v142_v31  ;;  %v117_v57 = vstv %s198_s25 }
  0x37   :  { %216 = vpow2.f32 %v192_v29  ;;  %v137_v62 = vstv %s203_s26  ;;  %v157_v2 = vstv %s208_s1  ;;  %v161_v6 = vstv %s378_s3  ;;  %p282_p5 = pnand %p281_p4, %p275_p1 }
  0x38   :  { %218 = vpow2.f32 %v197_v34  ;;  %v202_v39 = vmul.f32 -1.442695, %v129_v36  ;;  %v149_v40 = vadd.f32 %v148_v37, %v146_v38 }
  0x3a   :  { %220 = vpow2.f32 %v202_v39  ;;  %v207_v41 = vmul.f32 -1.442695, %v149_v40 }
  0x3c   :  { %222 = vpow2.f32 %v207_v41 }
  0x3f   :  { %v215_v42 = vpop.eup %214 }
  0x40   :  { %v74_v43 = vadd.f32 1.0, %v215_v42 }
  0x41   :  { %v217_v44 = vpop.eup %216 }
  0x42   :  { %224 = vrcp.f32 %v74_v43  ;;  %v93_v45 = vadd.f32 1.0, %v217_v44  ;;  %v219_v46 = vpop.eup %218 }
  0x43   :  { %v113_v47 = vadd.f32 1.0, %v219_v46 }
  0x44   :  { %226 = vrcp.f32 %v93_v45  ;;  %v221_v48 = vpop.eup %220 }
  0x45   :  { %228 = vrcp.f32 %v113_v47  ;;  %v133_v49 = vadd.f32 1.0, %v221_v48 }
  0x46   :  { %v223_v50 = vpop.eup %222 }
  0x47   :  { %230 = vrcp.f32 %v133_v49  ;;  %v153_v52 = vadd.f32 1.0, %v223_v50 }
  0x49   :  { %232 = vrcp.f32 %v153_v52 }
  0x4c   :  { %v225_v53 = vpop.eup %224 }
  0x4d   :  { %v79_v55 = vmul.f32 %v225_v53, %v78_v51 }
  0x4e   :  { %v227_v56 = vpop.eup %226 }
  0x4f   :  { %v98_v58 = vmul.f32 %v227_v56, %v97_v54  ;;  %v229_v59 = vpop.eup %228 }
  0x50   :  { %v118_v61 = vmul.f32 %v229_v59, %v117_v57 }
  0x51   :  { %v99_v60 = vadd.f32 %v98_v58, %v79_v55  ;;  %v231_v63 = vpop.eup %230 }
  0x52   :  { %v138_v1 = vmul.f32 %v231_v63, %v137_v62 }
  0x53   :  { %v119_v0 = vadd.f32 %v118_v61, %v99_v60  ;;  %v233_v3 = vpop.eup %232 }
  0x54   :  { %v158_v5 = vmul.f32 %v233_v3, %v157_v2 }
  0x55   :  { %v139_v4 = vadd.f32 %v138_v1, %v119_v0 }
  0x57   :  { %v159_v7 = vadd.f32 %v158_v5, %v139_v4 }
  0x59   :  { %v162_v8 = vadd.f32 %v161_v6, %v159_v7 }
  0x5b   :  { %v209_v9 = vmul.f32 -1.442695, %v162_v8 }
  0x5d   :  { %234 = vpow2.f32 %v209_v9 }
  0x67   :  { %v235_v10 = vpop.eup %234 }
  0x68   :  { %v166_v11 = vadd.f32 1.0, %v235_v10 }
  0x6a   :  { %236 = vrcp.f32 %v166_v11 }
  0x74   :  { %v237_v12 = vpop.eup %236 }
  0x75   :  { %169 = vst [vmem:[#allocation9] sm:$0xff] %v237_v12 }
  0x76   :  { %285 = shalt.err (!%p282_p5)
}
  0x77   :  { %s286_s7 = scalar_lea.hbm %s380_s5, 128 }
  0x78   :  { %p287_p6 = scmp.ne.s32.totalorder %s380_s5, %s286_s7  ;;  %p290_p7 = scmp.lt.u32.totalorder %s286_s7, %s380_s5 }
  0x7a   :  { %p292_p8 = pnand %p290_p7, %p287_p6 }
  0x7c   :  { %295 = shalt.err (!%p292_p8)
}
  0x7d   :  { %179 = dma.vmem_to_hbm [thread:$0]  %s177_s29, 128, %s380_s5, [#allocation4]  }
  0x7e   :  { %300 = dma.done.wait [#allocation4], 128  }
  0x7f   :  { %301 = vsyncadd [#allocation4], 4294967168 }
  0x80   :  { %183 = vsyncpa [#allocation4], 1 }
  0x81   :  { %184 = vsyncpa [#allocation5], 1 }
  0x82   :  { %185 = vsyncpa [#allocation7], 1 }

</bundles_post_ra>
